<compile_context>
chip_gen: v6e
topology: v6e:2x2x1
jax: 0.10.0
libtpu: 0.0.40
codegen_flags: <defaults>
</compile_context>

<pallas_src>
import functools

import jax
import jax.numpy as jnp
from jax.experimental import pallas as pl
from jax.experimental.pallas import tpu as pltpu


_LANE = 128      # lane width: last-dim padding unit
_SUBLANE = 8     # f32 sublane unit: batch-tile granularity


def _round_up(x, m):
    return (x + m - 1) // m * m


def _tpu_generation():
    """Best-effort Python-time chip query: (vmem_capacity_bytes, is_v5, is_v7x)."""
    kind = ""
    try:
        kind = jax.devices()[0].device_kind.lower()
    except Exception:
        pass
    is_v5 = "v5" in kind
    is_v7 = "7x" in kind or "v7" in kind
    vmem_cap = None
    try:
        vmem_cap = int(pltpu.get_tpu_info().vmem_capacity_bytes)
    except Exception:
        pass
    if vmem_cap is None:
        # v7x: 64 MiB/TC; v4/v5e/v6e: 128 MiB.  Unknown kind -> conservative.
        vmem_cap = (64 if (is_v7 or not kind) else 128) * 1024 * 1024
    return vmem_cap, is_v5, is_v7


def _choose_batch_tile(B, block_b, min_steps=2):
    """Multiple-of-8 batch tile minimising (padded rows + per-grid-step overhead)."""
    block_b = max(_SUBLANE, _round_up(block_b, _SUBLANE))
    bp0 = _round_up(max(B, 1), _SUBLANE)
    max_tb = min(block_b, bp0)
    can_multi_step = (bp0 // _SUBLANE) >= min_steps
    best_tb, best_cost = None, None
    for tb in range(_SUBLANE, max_tb + 1, _SUBLANE):
        steps = pl.cdiv(B, tb)
        if can_multi_step and steps < min_steps:
            continue   # keep >=2 grid steps so both v7x TCs get work
        rows = steps * tb
        cost = rows + 16 * steps        # dead rows + ~0.35us/step overhead proxy
        if best_cost is None or cost < best_cost or (cost == best_cost and tb > best_tb):
            best_tb, best_cost = tb, cost
    return best_tb if best_tb is not None else max_tb


def _two_layer_kernel(x_ref, w1_ref, b1_ref, w2_ref, b2_ref, out_ref, *,
                      bf16_epilogue):
    # In-kernel f32->bf16 cast of the activation tile (VPU filler under the MXU).
    x = x_ref[...].astype(jnp.bfloat16)
    # Layer 1: bf16 x bf16 -> f32 accumulate on the MXU.
    h = jnp.dot(x, w1_ref[...], preferred_element_type=jnp.float32)
    if bf16_epilogue:
        # v6e / v7x have a bf16 VPU: bias + ReLU in bf16 halves VALU work / vregs
        # and the VMEM footprint of the (TB, Hp) intermediate.
        h = h.astype(jnp.bfloat16) + b1_ref[...].astype(jnp.bfloat16)
        h = jnp.maximum(h, 0.0)
    else:
        # v5e has no bf16 VPU: keep the epilogue in f32, cast once for the MXU.
        h = jnp.maximum(h + b1_ref[...], 0.0).astype(jnp.bfloat16)
    # Layer 2: bf16 x bf16 -> f32 accumulate, f32 bias add.
    y = jnp.dot(h, w2_ref[...], preferred_element_type=jnp.float32)
    out_ref[...] = (y + b2_ref[...]).astype(out_ref.dtype)


def prepare_params(w1, b1, w2, b2):
    """One-time pad (to 128-lane multiples) + f32->bf16 cast of the weights.

    Call once and reuse across forward calls: keeps the padded bf16 copies cached
    on device instead of re-materialising them (extra HBM traffic) every call.

    w1: (D_in, H), b1: (H,), w2: (H, D_out), b2: (D_out,)  -- i.e. y = x @ W + b
    layout (PyTorch nn.Linear weights transposed).
    """
    D_in, H = w1.shape
    H2, D_out = w2.shape
    assert H2 == H and b1.shape == (H,) and b2.shape == (D_out,)
    Dp_in, Hp, Dp_out = (_round_up(d, _LANE) for d in (D_in, H, D_out))
    w1p = jnp.zeros((Dp_in, Hp), jnp.bfloat16).at[:D_in, :H].set(w1.astype(jnp.bfloat16))
    b1p = jnp.zeros((1, Hp), jnp.float32).at[0, :H].set(b1.astype(jnp.float32))
    w2p = jnp.zeros((Hp, Dp_out), jnp.bfloat16).at[:H, :D_out].set(w2.astype(jnp.bfloat16))
    b2p = jnp.zeros((1, Dp_out), jnp.float32).at[0, :D_out].set(b2.astype(jnp.float32))
    return {
        "w1": w1p, "b1": b1p, "w2": w2p, "b2": b2p,
        "dims": (D_in, H, D_out),
        "padded_dims": (Dp_in, Hp, Dp_out),
    }


def two_layer_nn_apply(params, x, *, block_b=None):
    """Fused forward pass relu(x @ W1 + b1) @ W2 + b2 using prepared params."""
    B, D_in = x.shape
    p_din, _H, D_out = params["dims"]
    assert D_in == p_din, "x feature dim does not match prepared params"
    Dp_in, Hp, Dp_out = params["padded_dims"]
    w1p, b1p, w2p, b2p = params["w1"], params["b1"], params["w2"], params["b2"]

    vmem_cap, is_v5, is_v7 = _tpu_generation()
    bf16_epilogue = not is_v5            # v5e: no bf16 VPU -> f32 epilogue
    if block_b is None:
        # v5e: 4x128^2 MXU, 256 is plenty; v7x: 64 MiB VMEM -> 256; v6e: 512.
        block_b = 256 if (is_v5 or is_v7) else 512

    TB = _choose_batch_tile(B, block_b)
    grid_steps = pl.cdiv(B, TB)
    grid = (grid_steps,)

    # Only the feature (lane) dim of x ever needs explicit zero padding (it feeds
    # the contraction); the batch edge block is handled by Pallas masked loads /
    # stores, so no batch padding is materialised.
    x_in = x.astype(jnp.float32)
    if D_in != Dp_in:
        x_in = jnp.zeros((B, Dp_in), jnp.float32).at[:, :D_in].set(x_in)

    kernel = functools.partial(_two_layer_kernel, bf16_epilogue=bf16_epilogue)

    flops = 2 * grid_steps * TB * (Dp_in * Hp + Hp * Dp_out)
    bytes_accessed = (x_in.size * 4 + w1p.size * 2 + w2p.size * 2
                      + b1p.size * 4 + b2p.size * 4 + B * Dp_out * 4)

    def build(single_buffer_weights):
        # VMEM budget: double-buffered x / out tiles, resident weights (single or
        # double buffered), plus the (TB, Hp) inter-layer activation and its bf16
        # copy feeding the second MXU pass.
        weight_bytes = (w1p.size + w2p.size) * 2 + (b1p.size + b2p.size) * 4
        wbufs = 1 if single_buffer_weights else 2
        h_bytes = TB * Hp * ((2 if bf16_epilogue else 4) + 2)
        vmem_bytes = 2 * TB * (Dp_in + Dp_out) * 4 + wbufs * weight_bytes + h_bytes
        vmem_limit = int(min(max(vmem_bytes * 3 // 2, 16 * 1024 * 1024),
                             int(vmem_cap * 0.85)))
        # TODO(synk): add a weight-streaming (Hp / Dp_in tiled, trailing
        # "arbitrary" grid axis + f32 accumulator) path for layers whose resident
        # bf16 weights approach v7x's 64 MiB VMEM.

        wmode = {"pipeline_mode": pl.Buffered(1)} if single_buffer_weights else {}
        in_specs = [
            pl.BlockSpec((TB, Dp_in), lambda i: (i, 0)),            # x: batch-tiled
            pl.BlockSpec((Dp_in, Hp), lambda i: (0, 0), **wmode),   # w1: VMEM-resident
            pl.BlockSpec((1, Hp), lambda i: (0, 0), **wmode),       # b1
            pl.BlockSpec((Hp, Dp_out), lambda i: (0, 0), **wmode),  # w2
            pl.BlockSpec((1, Dp_out), lambda i: (0, 0), **wmode),   # b2
        ]
        return pl.pallas_call(
            kernel,
            out_shape=jax.ShapeDtypeStruct((B, Dp_out), jnp.float32),
            grid=grid,
            in_specs=in_specs,
            out_specs=pl.BlockSpec((TB, Dp_out), lambda i: (i, 0)),
            compiler_params=pltpu.CompilerParams(
                dimension_semantics=("parallel",),   # batch axis: 2-TC shard on v7x
                vmem_limit_bytes=vmem_limit,
            ),
            cost_estimate=pl.CostEstimate(
                flops=flops, transcendentals=0, bytes_accessed=bytes_accessed),
        )

    # Prefer single-buffered resident weights (constant index_map => one DMA);
    # fall back to default double-buffering if this build rejects Buffered(1).
    try:
        out_p = build(True)(x_in, w1p, b1p, w2p, b2p)
    except Exception:
        out_p = build(False)(x_in, w1p, b1p, w2p, b2p)

    return out_p[:, :D_out] if D_out != Dp_out else out_p


def _reference(x, w1, b1, w2, b2):
    h = x @ w1 + b1
    return jnp.maximum(h, 0.0) @ w2 + b2


if __name__ == "__main__":
    # Shapes implied by the module: flat image features in, hidden H, D_out out.
    B, D_in, H, D_out = 8, 32, 64, 16

    key = jax.random.PRNGKey(0)
    kx, kw1, kb1, kw2, kb2, kx2 = jax.random.split(key, 6)

    # Deterministic "PyTorch-like" init: uniform(-1/sqrt(fan_in), 1/sqrt(fan_in)).
    x = jax.random.normal(kx, (B, D_in), dtype=jnp.float32)
    bound1 = 1.0 / jnp.sqrt(D_in)
    w1 = jax.random.uniform(kw1, (D_in, H), jnp.float32, -bound1, bound1)
    b1 = jax.random.uniform(kb1, (H,), jnp.float32, -bound1, bound1)
    bound2 = 1.0 / jnp.sqrt(H)
    w2 = jax.random.uniform(kw2, (H, D_out), jnp.float32, -bound2, bound2)
    b2 = jax.random.uniform(kb2, (D_out,), jnp.float32, -bound2, bound2)

    # One-time weight pad + bf16 cast, reused across both forward calls below.
    params = prepare_params(w1, b1, w2, b2)

    # Small batch (single grid step).
    y = jax.block_until_ready(two_layer_nn_apply(params, x))
    y_ref = _reference(x, w1, b1, w2, b2)
    assert y.shape == (B, D_out)
    # bf16 matmul inputs with f32 accumulation -> loosened tolerance vs f32 ref.
    assert jnp.allclose(y, y_ref, atol=2e-2, rtol=2e-2), "mismatch vs reference"

    # Larger, non-tile-aligned batch: multi-step "parallel" grid, padding-light
    # tile choice (TB=104 -> 2 steps), masked edge block.
    B2 = 200
    x2 = jax.random.normal(kx2, (B2, D_in), dtype=jnp.float32)
    y2 = jax.block_until_ready(two_layer_nn_apply(params, x2))
    y2_ref = _reference(x2, w1, b1, w2, b2)
    assert y2.shape == (B2, D_out)
    assert jnp.allclose(y2, y2_ref, atol=2e-2, rtol=2e-2), "mismatch vs reference (tiled)"

    print("KERNEL_OK")
</pallas_src>

<mosaic_0001>
module attributes {stable_mosaic.version = 11 : i64} {
  func.func @_two_layer_kernel(%arg0: i32, %arg1: memref<8x128xf32, #tpu.memory_space<vmem>>, %arg2: memref<128x128xbf16, #tpu.memory_space<vmem>>, %arg3: memref<1x128xf32, #tpu.memory_space<vmem>>, %arg4: memref<128x128xbf16, #tpu.memory_space<vmem>>, %arg5: memref<1x128xf32, #tpu.memory_space<vmem>>, %arg6: memref<8x128xf32, #tpu.memory_space<vmem>>) attributes {dimension_semantics = [#tpu.dimension_semantics<parallel>], iteration_bounds = array<i64: 1>, scalar_prefetch = 0 : i64, scratch_operands = 0 : i64, tpu.core_type = #tpu.core_type<tc>, window_params = [{transform_indices = @transform_0, window_bounds = array<i64: 8, 128>}, {pipeline_mode = #tpu.pipeline_mode<synchronous>, transform_indices = @transform_1, window_bounds = array<i64: 128, 128>}, {pipeline_mode = #tpu.pipeline_mode<synchronous>, transform_indices = @transform_2, window_bounds = array<i64: 1, 128>}, {pipeline_mode = #tpu.pipeline_mode<synchronous>, transform_indices = @transform_3, window_bounds = array<i64: 128, 128>}, {pipeline_mode = #tpu.pipeline_mode<synchronous>, transform_indices = @transform_4, window_bounds = array<i64: 1, 128>}, {transform_indices = @transform_5, window_bounds = array<i64: 8, 128>}]} {
    %c0 = arith.constant 0 : index
    %c0_0 = arith.constant 0 : index
    %0 = vector.load %arg1[%c0, %c0_0] : memref<8x128xf32, #tpu.memory_space<vmem>>, vector<8x128xf32>
    %1 = arith.truncf %0 : vector<8x128xf32> to vector<8x128xbf16>
    %c0_1 = arith.constant 0 : index
    %c0_2 = arith.constant 0 : index
    %2 = vector.load %arg2[%c0_1, %c0_2] : memref<128x128xbf16, #tpu.memory_space<vmem>>, vector<128x128xbf16>
    %cst = arith.constant dense<0.000000e+00> : vector<8x128xf32>
    %3 = tpu.matmul %1, %2, %cst {dimension_numbers = #tpu.dot_dimension_numbers<[1], [0], [0], [1], [0, 0, 1, 1], [], []>} : vector<8x128xbf16>, vector<128x128xbf16>, vector<8x128xf32> -> vector<8x128xf32>
    %4 = arith.truncf %3 : vector<8x128xf32> to vector<8x128xbf16>
    %c0_3 = arith.constant 0 : index
    %c0_4 = arith.constant 0 : index
    %5 = vector.load %arg3[%c0_3, %c0_4] : memref<1x128xf32, #tpu.memory_space<vmem>>, vector<1x128xf32>
    %6 = arith.truncf %5 : vector<1x128xf32> to vector<1x128xbf16>
    %7 = vector.broadcast %6 : vector<1x128xbf16> to vector<8x128xbf16>
    %8 = arith.addf %4, %7 : vector<8x128xbf16>
    %cst_5 = arith.constant 0.000000e+00 : bf16
    %9 = vector.broadcast %cst_5 : bf16 to vector<8x128xbf16>
    %10 = arith.maximumf %8, %9 : vector<8x128xbf16>
    %c0_6 = arith.constant 0 : index
    %c0_7 = arith.constant 0 : index
    %11 = vector.load %arg4[%c0_6, %c0_7] : memref<128x128xbf16, #tpu.memory_space<vmem>>, vector<128x128xbf16>
    %cst_8 = arith.constant dense<0.000000e+00> : vector<8x128xf32>
    %12 = tpu.matmul %10, %11, %cst_8 {dimension_numbers = #tpu.dot_dimension_numbers<[1], [0], [0], [1], [0, 0, 1, 1], [], []>} : vector<8x128xbf16>, vector<128x128xbf16>, vector<8x128xf32> -> vector<8x128xf32>
    %c0_9 = arith.constant 0 : index
    %c0_10 = arith.constant 0 : index
    %13 = vector.load %arg5[%c0_9, %c0_10] : memref<1x128xf32, #tpu.memory_space<vmem>>, vector<1x128xf32>
    %14 = vector.broadcast %13 : vector<1x128xf32> to vector<8x128xf32>
    %15 = arith.addf %12, %14 : vector<8x128xf32>
    %c0_11 = arith.constant 0 : index
    %c0_12 = arith.constant 0 : index
    %16 = vector.load %arg6[%c0_11, %c0_12] : memref<8x128xf32, #tpu.memory_space<vmem>>, vector<8x128xf32>
    tpu.vector_store %arg6[%c0_11, %c0_12], %15 {strides = array<i32>} : memref<8x128xf32, #tpu.memory_space<vmem>>, vector<8x128xf32>,
    return
  }
  func.func @transform_0(%arg0: i32) -> (i32, i32) {
    %c0_i32 = arith.constant 0 : i32
    %c0_i32_0 = arith.constant 0 : i32
    return %arg0, %c0_i32 : i32, i32
  }
  func.func @transform_1(%arg0: i32) -> (i32, i32) {
    %c0_i32 = arith.constant 0 : i32
    %c0_i32_0 = arith.constant 0 : i32
    %c0_i32_1 = arith.constant 0 : i32
    return %c0_i32, %c0_i32_0 : i32, i32
  }
  func.func @transform_2(%arg0: i32) -> (i32, i32) {
    %c0_i32 = arith.constant 0 : i32
    %c0_i32_0 = arith.constant 0 : i32
    %c0_i32_1 = arith.constant 0 : i32
    return %c0_i32, %c0_i32_0 : i32, i32
  }
  func.func @transform_3(%arg0: i32) -> (i32, i32) {
    %c0_i32 = arith.constant 0 : i32
    %c0_i32_0 = arith.constant 0 : i32
    %c0_i32_1 = arith.constant 0 : i32
    return %c0_i32, %c0_i32_0 : i32, i32
  }
  func.func @transform_4(%arg0: i32) -> (i32, i32) {
    %c0_i32 = arith.constant 0 : i32
    %c0_i32_0 = arith.constant 0 : i32
    %c0_i32_1 = arith.constant 0 : i32
    return %c0_i32, %c0_i32_0 : i32, i32
  }
  func.func @transform_5(%arg0: i32) -> (i32, i32) {
    %c0_i32 = arith.constant 0 : i32
    %c0_i32_0 = arith.constant 0 : i32
    return %arg0, %c0_i32 : i32, i32
  }
}

module attributes {stable_mosaic.version = 11 : i64} {
  func.func @_two_layer_kernel(%arg0: i32, %arg1: memref<8x128xf32, #tpu.memory_space<vmem>>, %arg2: memref<128x128xbf16, #tpu.memory_space<vmem>>, %arg3: memref<1x128xf32, #tpu.memory_space<vmem>>, %arg4: memref<128x128xbf16, #tpu.memory_space<vmem>>, %arg5: memref<1x128xf32, #tpu.memory_space<vmem>>, %arg6: memref<8x128xf32, #tpu.memory_space<vmem>>) attributes {dimension_semantics = [#tpu.dimension_semantics<parallel>], iteration_bounds = array<i64: 1>, scalar_prefetch = 0 : i64, scratch_operands = 0 : i64, tpu.core_type = #tpu.core_type<tc>, window_params = [{transform_indices = @transform_0, window_bounds = array<i64: 8, 128>}, {pipeline_mode = #tpu.pipeline_mode<synchronous>, transform_indices = @transform_1, window_bounds = array<i64: 128, 128>}, {pipeline_mode = #tpu.pipeline_mode<synchronous>, transform_indices = @transform_2, window_bounds = array<i64: 1, 128>}, {pipeline_mode = #tpu.pipeline_mode<synchronous>, transform_indices = @transform_3, window_bounds = array<i64: 128, 128>}, {pipeline_mode = #tpu.pipeline_mode<synchronous>, transform_indices = @transform_4, window_bounds = array<i64: 1, 128>}, {transform_indices = @transform_5, window_bounds = array<i64: 8, 128>}]} {
    %c0 = arith.constant 0 : index
    %c0_0 = arith.constant 0 : index
    %0 = vector.load %arg1[%c0, %c0_0] : memref<8x128xf32, #tpu.memory_space<vmem>>, vector<8x128xf32>
    %1 = arith.truncf %0 : vector<8x128xf32> to vector<8x128xbf16>
    %c0_1 = arith.constant 0 : index
    %c0_2 = arith.constant 0 : index
    %2 = vector.load %arg2[%c0_1, %c0_2] : memref<128x128xbf16, #tpu.memory_space<vmem>>, vector<128x128xbf16>
    %cst = arith.constant dense<0.000000e+00> : vector<8x128xf32>
    %3 = tpu.matmul %1, %2, %cst {dimension_numbers = #tpu.dot_dimension_numbers<[1], [0], [0], [1], [0, 0, 1, 1], [], []>} : vector<8x128xbf16>, vector<128x128xbf16>, vector<8x128xf32> -> vector<8x128xf32>
    %4 = arith.truncf %3 : vector<8x128xf32> to vector<8x128xbf16>
    %c0_3 = arith.constant 0 : index
    %c0_4 = arith.constant 0 : index
    %5 = vector.load %arg3[%c0_3, %c0_4] : memref<1x128xf32, #tpu.memory_space<vmem>>, vector<1x128xf32>
    %6 = arith.truncf %5 : vector<1x128xf32> to vector<1x128xbf16>
    %7 = vector.broadcast %6 : vector<1x128xbf16> to vector<8x128xbf16>
    %8 = arith.addf %4, %7 : vector<8x128xbf16>
    %cst_5 = arith.constant 0.000000e+00 : bf16
    %9 = vector.broadcast %cst_5 : bf16 to vector<8x128xbf16>
    %10 = arith.maximumf %8, %9 : vector<8x128xbf16>
    %c0_6 = arith.constant 0 : index
    %c0_7 = arith.constant 0 : index
    %11 = vector.load %arg4[%c0_6, %c0_7] : memref<128x128xbf16, #tpu.memory_space<vmem>>, vector<128x128xbf16>
    %cst_8 = arith.constant dense<0.000000e+00> : vector<8x128xf32>
    %12 = tpu.matmul %10, %11, %cst_8 {dimension_numbers = #tpu.dot_dimension_numbers<[1], [0], [0], [1], [0, 0, 1, 1], [], []>} : vector<8x128xbf16>, vector<128x128xbf16>, vector<8x128xf32> -> vector<8x128xf32>
    %c0_9 = arith.constant 0 : index
    %c0_10 = arith.constant 0 : index
    %13 = vector.load %arg5[%c0_9, %c0_10] : memref<1x128xf32, #tpu.memory_space<vmem>>, vector<1x128xf32>
    %14 = vector.broadcast %13 : vector<1x128xf32> to vector<8x128xf32>
    %15 = arith.addf %12, %14 : vector<8x128xf32>
    %c0_11 = arith.constant 0 : index
    %c0_12 = arith.constant 0 : index
    %16 = vector.load %arg6[%c0_11, %c0_12] : memref<8x128xf32, #tpu.memory_space<vmem>>, vector<8x128xf32>
    tpu.vector_store %arg6[%c0_11, %c0_12], %15 {strides = array<i32>} : memref<8x128xf32, #tpu.memory_space<vmem>>, vector<8x128xf32>,
    return
  }
  func.func @transform_0(%arg0: i32) -> (i32, i32) {
    %c0_i32 = arith.constant 0 : i32
    %c0_i32_0 = arith.constant 0 : i32
    return %arg0, %c0_i32 : i32, i32
  }
  func.func @transform_1(%arg0: i32) -> (i32, i32) {
    %c0_i32 = arith.constant 0 : i32
    %c0_i32_0 = arith.constant 0 : i32
    %c0_i32_1 = arith.constant 0 : i32
    return %c0_i32, %c0_i32_0 : i32, i32
  }
  func.func @transform_2(%arg0: i32) -> (i32, i32) {
    %c0_i32 = arith.constant 0 : i32
    %c0_i32_0 = arith.constant 0 : i32
    %c0_i32_1 = arith.constant 0 : i32
    return %c0_i32, %c0_i32_0 : i32, i32
  }
  func.func @transform_3(%arg0: i32) -> (i32, i32) {
    %c0_i32 = arith.constant 0 : i32
    %c0_i32_0 = arith.constant 0 : i32
    %c0_i32_1 = arith.constant 0 : i32
    return %c0_i32, %c0_i32_0 : i32, i32
  }
  func.func @transform_4(%arg0: i32) -> (i32, i32) {
    %c0_i32 = arith.constant 0 : i32
    %c0_i32_0 = arith.constant 0 : i32
    %c0_i32_1 = arith.constant 0 : i32
    return %c0_i32, %c0_i32_0 : i32, i32
  }
  func.func @transform_5(%arg0: i32) -> (i32, i32) {
    %c0_i32 = arith.constant 0 : i32
    %c0_i32_0 = arith.constant 0 : i32
    return %arg0, %c0_i32 : i32, i32
  }
}

</mosaic_0001>

<bundles_post_ra>
// kernel: tpu_custom_call.1
= control target key start
LH: loop header
LB: loop body
LE: loop exit
PB: predicated region body
PF: predicated region fallthrough
CT: control target
= control target key end

     0   :  { %10 = vsyncpa [#allocation3], 0  ;;  %s550_s0 = inlined_call_operand.hbm [shape: f32[8,128], index: 0, kind: input, shape index: {}]   ;;  %s551_s1 = inlined_call_operand.hbm [shape: bf16[128,128], index: 1, kind: input, shape index: {}]   ;;  %s552_s2 = inlined_call_operand.vmem [shape: f32[1,128], index: 2, kind: input, shape index: {}]   ;;  %s553_s3 = inlined_call_operand.hbm [shape: bf16[128,128], index: 3, kind: input, shape index: {}]   ;;  %s554_s4 = inlined_call_operand.vmem [shape: f32[1,128], index: 4, kind: input, shape index: {}]   ;;  %s555_s5 = inlined_call_operand.hbm [shape: f32[8,128], index: 5, kind: output, shape index: {}]  }
   0x1   :  { %11 = vsyncpa [#allocation6], 0 }
   0x2   :  { %12 = vsyncpa [#allocation4], 0  ;;  %s493_s18 = smov [#allocation5]  }
   0x3   :  { %s28_s19 = sshll.u32 %s493_s18, 4  ;;  %s29_s19 = int_to_ptr.vmem [resolvable:$true] %s28_s19 }
   0x4   :  { %s415_s20 = scalar_lea.vmem %s29_s19, 1024  ;;  %p420_p1 = scmp.lt.s32.totalorder %s29_s19, %s29_s19 }
   0x5   :  { %p416_p0 = scmp.ne.s32.totalorder %s29_s19, %s415_s20  ;;  %p421_p2 = scmp.lt.s32.totalorder %s415_s20, %s415_s20 }
   0x7   :  { %p422_p3 = por %p421_p2, %p420_p1 }
   0x9   :  { %p423_p4 = pnand %p422_p3, %p416_p0 }
   0xb   :  { %426 = shalt.err (!%p423_p4)
}
   0xc   :  { %s494_s21 = smov 64   ;;  %s495_s22 = smov 4  }
   0xd   :  { %34 = dma.hbm_to_vmem [thread:$0]  %s551_s1, 1024, %s29_s19, [#allocation6], %s494_s21, %s494_s21, %s495_s22  }
   0xe   :  { %s496_s25 = smov [#allocation2]   ;;  %s497_s27 = smov [#allocation7]  }
   0xf   :  { %s19_s26 = sshll.u32 %s496_s25, 4  ;;  %s42_s28 = sshll.u32 %s497_s27, 4  ;;  %s20_s26 = int_to_ptr.vmem [resolvable:$true] %s19_s26  ;;  %s43_s28 = int_to_ptr.vmem [resolvable:$true] %s42_s28 }
  0x10   :  { %s435_s29 = scalar_lea.vmem %s20_s26, 128  ;;  %p440_p6 = scmp.lt.s32.totalorder %s20_s26, %s20_s26 }
  0x11   :  { %p436_p5 = scmp.ne.s32.totalorder %s20_s26, %s435_s29  ;;  %p441_p7 = scmp.lt.s32.totalorder %s435_s29, %s435_s29 }
  0x13   :  { %p442_p8 = por %p441_p7, %p440_p6 }
  0x15   :  { %p443_p9 = pnand %p442_p8, %p436_p5 }
  0x17   :  { %446 = shalt.err (!%p443_p9)
}
  0x18   :  { %22 = dma.hbm_to_vmem [thread:$0]  %s550_s0, 128, %s20_s26, [#allocation3]  }
  0x19   :  { %s455_s7 = scalar_lea.vmem %s43_s28, 1024  ;;  %p460_p11 = scmp.lt.s32.totalorder %s43_s28, %s43_s28 }
  0x1a   :  { %p456_p10 = scmp.ne.s32.totalorder %s43_s28, %s455_s7  ;;  %p461_p12 = scmp.lt.s32.totalorder %s455_s7, %s455_s7 }
  0x1c   :  { %p462_p13 = por %p461_p12, %p460_p11 }
  0x1e   :  { %p463_p0 = pnand %p462_p13, %p456_p10 }
  0x20   :  { %466 = shalt.err (!%p463_p0)
}
  0x21   :  { %48 = dma.hbm_to_vmem [thread:$0]  %s553_s3, 1024, %s43_s28, [#allocation6], %s494_s21, %s494_s21, %s495_s22  }
  0x22   :  { %487 = dma.done.wait [#allocation3], 128  }
  0x23   :  { %488 = vsyncadd [#allocation3], 4294967168 }
  0x24   :  { %489 = dma.done.wait [#allocation6], 2048  }
  0x25   :  { %490 = vsyncadd [#allocation6], 4294965248  ;;  %v498_v0 = vmov 0.0   ;;  %vm499_vm0 = vmmov 0   ;;  %v391_v1 = vld [vmem:[#allocation5 + $0x38] sm:$0xff]   ;;  %v392_v2 = vld [vmem:[#allocation5 + $0x30] sm:$0xff]   ;;  %v173_v19 = vlaneseq }
  0x26   :  { %342 = vmatprep.subr.bf16.mxu0 %v498_v0  ;;  %358 = vmatprep.mubr.msk.bf16.mxu0 %vm499_vm0, %v498_v0  ;;  %v393_v3 = vld [vmem:[#allocation5 + $0x28] sm:$0xff]   ;;  %v399_v4 = vld [vmem:[#allocation7 + $0x38] sm:$0xff]   ;;  %v394_v5 = vld [vmem:[#allocation5 + $0x20] sm:$0xff]   ;;  %v500_v31 = vmov 0   ;;  %s501_s11 = smov [#allocation8]  }
  0x27   :  { %362 = vmatprep.subr.bf16.mxu1 %v498_v0  ;;  %378 = vmatprep.mubr.msk.bf16.mxu1 %vm499_vm0, %v498_v0  ;;  %v400_v6 = vld [vmem:[#allocation7 + $0x30] sm:$0xff]   ;;  %v395_v7 = vld [vmem:[#allocation5 + $0x18] sm:$0xff]   ;;  %v401_v8 = vld [vmem:[#allocation7 + $0x28] sm:$0xff]   ;;  %v174_v22 = vshrl.u32 %v173_v19, 7 }
  0x28   :  { %343 = vmatpush3.bf16.msra.mxu0 %v391_v1  ;;  %363 = vmatpush3.bf16.msra.mxu1 %v399_v4  ;;  %v396_v9 = vld [vmem:[#allocation5 + $0x10] sm:$0xff]   ;;  %v402_v10 = vld [vmem:[#allocation7 + $0x20] sm:$0xff]   ;;  %v397_v11 = vld [vmem:[#allocation5 + $0x8] sm:$0xff]  }
  0x29   :  { %344 = vmatprep.subr.bf16.mxu0 %v498_v0  ;;  %364 = vmatprep.subr.bf16.mxu1 %v498_v0  ;;  %v403_v12 = vld [vmem:[#allocation7 + $0x18] sm:$0xff]   ;;  %v398_v13 = vld [vmem:[#allocation5] sm:$0xff]   ;;  %v404_v15 = vld [vmem:[#allocation7 + $0x10] sm:$0xff]   ;;  %v175_v24 = vsub.s32 0, %v174_v22 }
  0x2a   :  { %v61_v14 = vld [vmem:[#allocation2] sm:$0xff]  ;;  %v405_v17 = vld [vmem:[#allocation7 + $0x8] sm:$0xff]   ;;  %v406_v18 = vld [vmem:[#allocation7] sm:$0xff]  }
  0x2b   :  { %v62_v16 = vpack.c.bf16 %v61_v14, %v61_v14  ;;  %v168_v20 = vld [vmem:[%s552_s2] sm:$0x1]  ;;  %s297_s2 = sshll.u32 %s501_s11, 4  ;;  %s298_s2 = int_to_ptr.vmem [resolvable:$true] %s297_s2 }
  0x2c   :  { %345 = vmatpush3.bf16.msra.mxu0 %v392_v2  ;;  %365 = vmatpush3.bf16.msra.mxu1 %v400_v6  ;;  %v169_v21 = vpack.c.bf16 %v168_v20, %v168_v20  ;;  %v315_v34 = vld [vmem:[%s554_s4] ss:$0 sm:$0xff]  ;;  %s467_s12 = scalar_lea.vmem %s298_s2, 128  ;;  %p472_p2 = scmp.lt.s32.totalorder %s298_s2, %s298_s2 }
  0x2d   :  { %346 = vmatprep.subr.bf16.mxu0 %v498_v0  ;;  %366 = vmatprep.subr.bf16.mxu1 %v498_v0  ;;  %p468_p1 = scmp.ne.s32.totalorder %s298_s2, %s467_s12  ;;  %p473_p3 = scmp.lt.s32.totalorder %s467_s12, %s467_s12 }
  0x2e   :  { %v171_v23 = vpack.i.b16 %v169_v21, %v169_v21 }
  0x2f   :  { %p474_p4 = por %p473_p3, %p472_p2 }
  0x30   :  { %347 = vmatpush3.bf16.msra.mxu0 %v393_v3  ;;  %367 = vmatpush3.bf16.msra.mxu1 %v401_v8  ;;  %v176_v25 = vrot.slane %v171_v23, %v175_v24 }
  0x31   :  { %348 = vmatprep.subr.bf16.mxu0 %v498_v0  ;;  %368 = vmatprep.subr.bf16.mxu1 %v498_v0  ;;  %p475_p5 = pnand %p474_p4, %p468_p1 }
  0x34   :  { %349 = vmatpush3.bf16.msra.mxu0 %v394_v5  ;;  %369 = vmatpush3.bf16.msra.mxu1 %v402_v10 }
  0x35   :  { %350 = vmatprep.subr.bf16.mxu0 %v498_v0  ;;  %370 = vmatprep.subr.bf16.mxu1 %v498_v0 }
  0x38   :  { %351 = vmatpush3.bf16.msra.mxu0 %v395_v7  ;;  %371 = vmatpush3.bf16.msra.mxu1 %v403_v12 }
  0x39   :  { %352 = vmatprep.subr.bf16.mxu0 %v498_v0  ;;  %372 = vmatprep.subr.bf16.mxu1 %v498_v0 }
  0x3c   :  { %353 = vmatpush3.bf16.msra.mxu0 %v396_v9  ;;  %373 = vmatpush3.bf16.msra.mxu1 %v404_v15 }
  0x3d   :  { %354 = vmatprep.subr.bf16.mxu0 %v498_v0  ;;  %374 = vmatprep.subr.bf16.mxu1 %v498_v0 }
  0x40   :  { %355 = vmatpush3.bf16.msra.mxu0 %v397_v11  ;;  %375 = vmatpush3.bf16.msra.mxu1 %v405_v17 }
  0x41   :  { %356 = vmatprep.subr.bf16.mxu0 %v498_v0  ;;  %376 = vmatprep.subr.bf16.mxu1 %v498_v0 }
  0x44   :  { %357 = vmatpush3.bf16.msra.mxu0 %v398_v13  ;;  %377 = vmatpush3.bf16.msra.mxu1 %v406_v18 }
  0x47   :  { %359 = vmatmul.mubr.bf16.vlgmr.msra.gmra.mxu0 %v62_v16 }
 0x107   :  { %v161_v26 = vpop.f32.mrf.mxu0 }
 0x108   :  { %v167_v27 = vpack.c.bf16 %v161_v26, %v161_v26 }
 0x109   :  { %v360_v28 = vpop.f32.mrf.mxu0 }
 0x10a   :  { %v177_v29 = vadd.bf16 %v176_v25, %v167_v27 }
 0x10b   :  { %v164_v30 = vpop.f32.mrf.mxu0 }
 0x10c   :  { %v178_v32 = vmax.bf16 %v500_v31, %v177_v29 }
 0x10d   :  { %v361_v33 = vpop.f32.mrf.mxu0 }
 0x10e   :  { %379 = vmatmul.mubr.bf16.vlgmr.msra.gmra.mxu1 %v178_v32 }
 0x1ce   :  { %v284_v35 = vpop.f32.mrf.mxu1 }
 0x1cf   :  { %v285_v36 = vadd.f32 %v315_v34, %v284_v35 }
 0x1d0   :  { %v380_v37 = vpop.f32.mrf.mxu1 }
 0x1d1   :  { %290 = vst [vmem:[#allocation8] sm:$0xff] %v285_v36 }
 0x1d2   :  { %v287_v38 = vpop.f32.mrf.mxu1 }
 0x1d3   :  { %478 = shalt.err (!%p475_p5)
}
 0x1d4   :  { %300 = dma.vmem_to_hbm [thread:$0]  %s298_s2, 128, %s555_s5, [#allocation4]   ;;  %v381_v39 = vpop.f32.mrf.mxu1 }
 0x1d5   :  { %491 = dma.done.wait [#allocation4], 128  }
 0x1d6   :  { %492 = vsyncadd [#allocation4], 4294967168 }
 0x1d7   :  { %304 = vsyncpa [#allocation3], 1 }
 0x1d8   :  { %305 = vsyncpa [#allocation6], 1 }
 0x1d9   :  { %306 = vsyncpa [#allocation4], 1 }

// kernel: tpu_custom_call.1
= control target key start
LH: loop header
LB: loop body
LE: loop exit
PB: predicated region body
PF: predicated region fallthrough
CT: control target
= control target key end

     0   :  { %10 = vsyncpa [#allocation3], 0  ;;  %s550_s0 = inlined_call_operand.hbm [shape: f32[8,128], index: 0, kind: input, shape index: {}]   ;;  %s551_s1 = inlined_call_operand.hbm [shape: bf16[128,128], index: 1, kind: input, shape index: {}]   ;;  %s552_s2 = inlined_call_operand.vmem [shape: f32[1,128], index: 2, kind: input, shape index: {}]   ;;  %s553_s3 = inlined_call_operand.hbm [shape: bf16[128,128], index: 3, kind: input, shape index: {}]   ;;  %s554_s4 = inlined_call_operand.vmem [shape: f32[1,128], index: 4, kind: input, shape index: {}]   ;;  %s555_s5 = inlined_call_operand.hbm [shape: f32[8,128], index: 5, kind: output, shape index: {}]  }
   0x1   :  { %11 = vsyncpa [#allocation6], 0 }
   0x2   :  { %12 = vsyncpa [#allocation4], 0  ;;  %s493_s18 = smov [#allocation5]  }
   0x3   :  { %s28_s19 = sshll.u32 %s493_s18, 4  ;;  %s29_s19 = int_to_ptr.vmem [resolvable:$true] %s28_s19 }
   0x4   :  { %s415_s20 = scalar_lea.vmem %s29_s19, 1024  ;;  %p420_p1 = scmp.lt.s32.totalorder %s29_s19, %s29_s19 }
   0x5   :  { %p416_p0 = scmp.ne.s32.totalorder %s29_s19, %s415_s20  ;;  %p421_p2 = scmp.lt.s32.totalorder %s415_s20, %s415_s20 }
   0x7   :  { %p422_p3 = por %p421_p2, %p420_p1 }
   0x9   :  { %p423_p4 = pnand %p422_p3, %p416_p0 }
   0xb   :  { %426 = shalt.err (!%p423_p4)
}
   0xc   :  { %s494_s21 = smov 64   ;;  %s495_s22 = smov 4  }
   0xd   :  { %34 = dma.hbm_to_vmem [thread:$0]  %s551_s1, 1024, %s29_s19, [#allocation6], %s494_s21, %s494_s21, %s495_s22  }
   0xe   :  { %s496_s25 = smov [#allocation2]   ;;  %s497_s27 = smov [#allocation7]  }
   0xf   :  { %s19_s26 = sshll.u32 %s496_s25, 4  ;;  %s42_s28 = sshll.u32 %s497_s27, 4  ;;  %s20_s26 = int_to_ptr.vmem [resolvable:$true] %s19_s26  ;;  %s43_s28 = int_to_ptr.vmem [resolvable:$true] %s42_s28 }
  0x10   :  { %s435_s29 = scalar_lea.vmem %s20_s26, 128  ;;  %p440_p6 = scmp.lt.s32.totalorder %s20_s26, %s20_s26 }
  0x11   :  { %p436_p5 = scmp.ne.s32.totalorder %s20_s26, %s435_s29  ;;  %p441_p7 = scmp.lt.s32.totalorder %s435_s29, %s435_s29 }
  0x13   :  { %p442_p8 = por %p441_p7, %p440_p6 }
  0x15   :  { %p443_p9 = pnand %p442_p8, %p436_p5 }
  0x17   :  { %446 = shalt.err (!%p443_p9)
}
  0x18   :  { %22 = dma.hbm_to_vmem [thread:$0]  %s550_s0, 128, %s20_s26, [#allocation3]  }
  0x19   :  { %s455_s7 = scalar_lea.vmem %s43_s28, 1024  ;;  %p460_p11 = scmp.lt.s32.totalorder %s43_s28, %s43_s28 }
  0x1a   :  { %p456_p10 = scmp.ne.s32.totalorder %s43_s28, %s455_s7  ;;  %p461_p12 = scmp.lt.s32.totalorder %s455_s7, %s455_s7 }
  0x1c   :  { %p462_p13 = por %p461_p12, %p460_p11 }
  0x1e   :  { %p463_p0 = pnand %p462_p13, %p456_p10 }
  0x20   :  { %466 = shalt.err (!%p463_p0)
}
  0x21   :  { %48 = dma.hbm_to_vmem [thread:$0]  %s553_s3, 1024, %s43_s28, [#allocation6], %s494_s21, %s494_s21, %s495_s22  }
  0x22   :  { %487 = dma.done.wait [#allocation3], 128  }
  0x23   :  { %488 = vsyncadd [#allocation3], 4294967168 }
  0x24   :  { %489 = dma.done.wait [#allocation6], 2048  }
  0x25   :  { %490 = vsyncadd [#allocation6], 4294965248  ;;  %v498_v0 = vmov 0.0   ;;  %vm499_vm0 = vmmov 0   ;;  %v391_v1 = vld [vmem:[#allocation5 + $0x38] sm:$0xff]   ;;  %v392_v2 = vld [vmem:[#allocation5 + $0x30] sm:$0xff]   ;;  %v173_v19 = vlaneseq }
  0x26   :  { %342 = vmatprep.subr.bf16.mxu0 %v498_v0  ;;  %358 = vmatprep.mubr.msk.bf16.mxu0 %vm499_vm0, %v498_v0  ;;  %v393_v3 = vld [vmem:[#allocation5 + $0x28] sm:$0xff]   ;;  %v399_v4 = vld [vmem:[#allocation7 + $0x38] sm:$0xff]   ;;  %v394_v5 = vld [vmem:[#allocation5 + $0x20] sm:$0xff]   ;;  %v500_v31 = vmov 0   ;;  %s501_s11 = smov [#allocation8]  }
  0x27   :  { %362 = vmatprep.subr.bf16.mxu1 %v498_v0  ;;  %378 = vmatprep.mubr.msk.bf16.mxu1 %vm499_vm0, %v498_v0  ;;  %v400_v6 = vld [vmem:[#allocation7 + $0x30] sm:$0xff]   ;;  %v395_v7 = vld [vmem:[#allocation5 + $0x18] sm:$0xff]   ;;  %v401_v8 = vld [vmem:[#allocation7 + $0x28] sm:$0xff]   ;;  %v174_v22 = vshrl.u32 %v173_v19, 7 }
  0x28   :  { %343 = vmatpush3.bf16.msra.mxu0 %v391_v1  ;;  %363 = vmatpush3.bf16.msra.mxu1 %v399_v4  ;;  %v396_v9 = vld [vmem:[#allocation5 + $0x10] sm:$0xff]   ;;  %v402_v10 = vld [vmem:[#allocation7 + $0x20] sm:$0xff]   ;;  %v397_v11 = vld [vmem:[#allocation5 + $0x8] sm:$0xff]  }
  0x29   :  { %344 = vmatprep.subr.bf16.mxu0 %v498_v0  ;;  %364 = vmatprep.subr.bf16.mxu1 %v498_v0  ;;  %v403_v12 = vld [vmem:[#allocation7 + $0x18] sm:$0xff]   ;;  %v398_v13 = vld [vmem:[#allocation5] sm:$0xff]   ;;  %v404_v15 = vld [vmem:[#allocation7 + $0x10] sm:$0xff]   ;;  %v175_v24 = vsub.s32 0, %v174_v22 }
  0x2a   :  { %v61_v14 = vld [vmem:[#allocation2] sm:$0xff]  ;;  %v405_v17 = vld [vmem:[#allocation7 + $0x8] sm:$0xff]   ;;  %v406_v18 = vld [vmem:[#allocation7] sm:$0xff]  }
  0x2b   :  { %v62_v16 = vpack.c.bf16 %v61_v14, %v61_v14  ;;  %v168_v20 = vld [vmem:[%s552_s2] sm:$0x1]  ;;  %s297_s2 = sshll.u32 %s501_s11, 4  ;;  %s298_s2 = int_to_ptr.vmem [resolvable:$true] %s297_s2 }
  0x2c   :  { %345 = vmatpush3.bf16.msra.mxu0 %v392_v2  ;;  %365 = vmatpush3.bf16.msra.mxu1 %v400_v6  ;;  %v169_v21 = vpack.c.bf16 %v168_v20, %v168_v20  ;;  %v315_v34 = vld [vmem:[%s554_s4] ss:$0 sm:$0xff]  ;;  %s467_s12 = scalar_lea.vmem %s298_s2, 128  ;;  %p472_p2 = scmp.lt.s32.totalorder %s298_s2, %s298_s2 }
  0x2d   :  { %346 = vmatprep.subr.bf16.mxu0 %v498_v0  ;;  %366 = vmatprep.subr.bf16.mxu1 %v498_v0  ;;  %p468_p1 = scmp.ne.s32.totalorder %s298_s2, %s467_s12  ;;  %p473_p3 = scmp.lt.s32.totalorder %s467_s12, %s467_s12 }
  0x2e   :  { %v171_v23 = vpack.i.b16 %v169_v21, %v169_v21 }
  0x2f   :  { %p474_p4 = por %p473_p3, %p472_p2 }
  0x30   :  { %347 = vmatpush3.bf16.msra.mxu0 %v393_v3  ;;  %367 = vmatpush3.bf16.msra.mxu1 %v401_v8  ;;  %v176_v25 = vrot.slane %v171_v23, %v175_v24 }
  0x31   :  { %348 = vmatprep.subr.bf16.mxu0 %v498_v0  ;;  %368 = vmatprep.subr.bf16.mxu1 %v498_v0  ;;  %p475_p5 = pnand %p474_p4, %p468_p1 }
  0x34   :  { %349 = vmatpush3.bf16.msra.mxu0 %v394_v5  ;;  %369 = vmatpush3.bf16.msra.mxu1 %v402_v10 }
  0x35   :  { %350 = vmatprep.subr.bf16.mxu0 %v498_v0  ;;  %370 = vmatprep.subr.bf16.mxu1 %v498_v0 }
  0x38   :  { %351 = vmatpush3.bf16.msra.mxu0 %v395_v7  ;;  %371 = vmatpush3.bf16.msra.mxu1 %v403_v12 }
  0x39   :  { %352 = vmatprep.subr.bf16.mxu0 %v498_v0  ;;  %372 = vmatprep.subr.bf16.mxu1 %v498_v0 }
  0x3c   :  { %353 = vmatpush3.bf16.msra.mxu0 %v396_v9  ;;  %373 = vmatpush3.bf16.msra.mxu1 %v404_v15 }
  0x3d   :  { %354 = vmatprep.subr.bf16.mxu0 %v498_v0  ;;  %374 = vmatprep.subr.bf16.mxu1 %v498_v0 }
  0x40   :  { %355 = vmatpush3.bf16.msra.mxu0 %v397_v11  ;;  %375 = vmatpush3.bf16.msra.mxu1 %v405_v17 }
  0x41   :  { %356 = vmatprep.subr.bf16.mxu0 %v498_v0  ;;  %376 = vmatprep.subr.bf16.mxu1 %v498_v0 }
  0x44   :  { %357 = vmatpush3.bf16.msra.mxu0 %v398_v13  ;;  %377 = vmatpush3.bf16.msra.mxu1 %v406_v18 }
  0x47   :  { %359 = vmatmul.mubr.bf16.vlgmr.msra.gmra.mxu0 %v62_v16 }
 0x107   :  { %v161_v26 = vpop.f32.mrf.mxu0 }
 0x108   :  { %v167_v27 = vpack.c.bf16 %v161_v26, %v161_v26 }
 0x109   :  { %v360_v28 = vpop.f32.mrf.mxu0 }
 0x10a   :  { %v177_v29 = vadd.bf16 %v176_v25, %v167_v27 }
 0x10b   :  { %v164_v30 = vpop.f32.mrf.mxu0 }
 0x10c   :  { %v178_v32 = vmax.bf16 %v500_v31, %v177_v29 }
 0x10d   :  { %v361_v33 = vpop.f32.mrf.mxu0 }
 0x10e   :  { %379 = vmatmul.mubr.bf16.vlgmr.msra.gmra.mxu1 %v178_v32 }
 0x1ce   :  { %v284_v35 = vpop.f32.mrf.mxu1 }
 0x1cf   :  { %v285_v36 = vadd.f32 %v315_v34, %v284_v35 }
 0x1d0   :  { %v380_v37 = vpop.f32.mrf.mxu1 }
 0x1d1   :  { %290 = vst [vmem:[#allocation8] sm:$0xff] %v285_v36 }
 0x1d2   :  { %v287_v38 = vpop.f32.mrf.mxu1 }
 0x1d3   :  { %478 = shalt.err (!%p475_p5)
}
 0x1d4   :  { %300 = dma.vmem_to_hbm [thread:$0]  %s298_s2, 128, %s555_s5, [#allocation4]   ;;  %v381_v39 = vpop.f32.mrf.mxu1 }
 0x1d5   :  { %491 = dma.done.wait [#allocation4], 128  }
 0x1d6   :  { %492 = vsyncadd [#allocation4], 4294967168 }
 0x1d7   :  { %304 = vsyncpa [#allocation3], 1 }
 0x1d8   :  { %305 = vsyncpa [#allocation6], 1 }
 0x1d9   :  { %306 = vsyncpa [#allocation4], 1 }

</bundles_post_ra>
